<compile_context>
chip_gen: v5e
topology: v5e:2x2
jax: 0.10.0
libtpu: 0.0.40
codegen_flags: <defaults>
</compile_context>

<pallas_src>
import math

import jax
import jax.numpy as jnp
from jax.experimental import pallas as pl
from jax.experimental.pallas import tpu as pltpu

_MIB = 1024 * 1024
_TARGET_TILE_BYTES = 4 * _MIB   # per live buffer; in+out double-buffered ~16 MiB
_VMEM_LIMIT_BYTES = 32 * _MIB   # explicit scoped-VMEM limit (v5e default is 16 MiB)


def _copy_kernel(x_ref, o_ref):
    # Pure vld/vst identity copy of one lane-dense tile.
    o_ref[...] = x_ref[...]


def _round_up(x, m):
    return ((x + m - 1) // m) * m


def _sublane_pack(dtype):
    # vreg sublane packing: f32 -> 8 rows, bf16/f16 -> 16, int8/fp8 -> 32.
    return max(8, 32 // max(jnp.dtype(dtype).itemsize, 1))


def _materialize_tiling(b, feat, dtype):
    """Pick (tile_b, tile_f) for the identity copy.

    tile_f is always a multiple of 128 (lane-dense, unmasked stores on full
    blocks); tile_b is a multiple of the dtype's sublane pack or the full
    batch. The grid uses pl.cdiv, so neither tile has to divide its dim.
    """
    itemsize = jnp.dtype(dtype).itemsize
    sub = _sublane_pack(dtype)

    # Lane tile: big multiple of 128; cdiv pads any ragged remainder.
    tile_f = min(2048, _round_up(feat, 128))

    # Sublane tile: aim for ~_TARGET_TILE_BYTES per buffer.
    rows = max(1, _TARGET_TILE_BYTES // max(tile_f * itemsize, 1))
    tile_b = max(sub, (rows // sub) * sub)

    if b <= sub:
        tile_b = b                      # full-dim block is always legal
    elif tile_b >= b:
        if feat <= tile_f and b >= 2 * sub:
            # Single lane block: split the batch so the grid keeps >=2 blocks
            # (v7x megacore: both TensorCores stream HBM concurrently).
            half = (b + 1) // 2
            tile_b = _round_up(half, sub)
        else:
            tile_b = b                  # full-dim block (lane axis already tiled)
    return tile_b, tile_f


def flatten_layer(x, *, materialize=False):
    """PyTorch FlattenLayer.forward: x.view(x.shape[0], -1).

    Default path is a metadata-only reshape (no kernel launch). Set
    materialize=True to force a tiled, pipelined Pallas identity copy into a
    fresh buffer (only when a kernel boundary is explicitly wanted).
    """
    b = x.shape[0]
    feat = int(math.prod(x.shape[1:]))

    # Row-major reshape matches torch .view on a contiguous tensor.
    x2d = jnp.reshape(x, (b, feat))
    if not materialize:
        return x2d

    # TODO(synk): if profiling shows the reshape above lowering to its own HBM
    # relayout copy, fuse the flatten into the kernel (ND input block + VMEM
    # reshape) to collapse the two HBM passes into one.
    tile_b, tile_f = _materialize_tiling(b, feat, x.dtype)
    grid = (pl.cdiv(b, tile_b), pl.cdiv(feat, tile_f))
    itemsize = jnp.dtype(x.dtype).itemsize

    return pl.pallas_call(
        _copy_kernel,
        out_shape=jax.ShapeDtypeStruct((b, feat), x.dtype),
        grid=grid,
        in_specs=[pl.BlockSpec((tile_b, tile_f), lambda i, j: (i, j))],
        out_specs=pl.BlockSpec((tile_b, tile_f), lambda i, j: (i, j)),
        compiler_params=pltpu.CompilerParams(
            dimension_semantics=("parallel", "parallel"),
            vmem_limit_bytes=_VMEM_LIMIT_BYTES),
        cost_estimate=pl.CostEstimate(
            flops=0, transcendentals=0,
            bytes_accessed=2 * b * feat * itemsize),
    )(x2d)


if __name__ == "__main__":
    key = jax.random.PRNGKey(0)
    k1, k2, k3, k4 = jax.random.split(key, 4)

    # Primary small NCHW input: batch=2, channels=4, spatial=16x16 -> feat=1024.
    x = jax.random.normal(k1, (2, 4, 16, 16), dtype=jnp.float32)
    ref = jnp.reshape(x, (x.shape[0], -1))

    y_fast = jax.block_until_ready(flatten_layer(x))                      # metadata path
    y_kernel = jax.block_until_ready(flatten_layer(x, materialize=True))  # Pallas copy path

    assert y_fast.shape == (2, 1024) and y_kernel.shape == (2, 1024)
    assert y_fast.dtype == x.dtype and y_kernel.dtype == x.dtype
    assert bool(jnp.array_equal(y_fast, ref)), "mismatch (fast path)"
    assert bool(jnp.array_equal(y_kernel, ref)), "mismatch (kernel path)"

    # Ragged batch (b=20, not a multiple of 8): exercises the cdiv grid with a
    # padded last batch block and the >=2-block split for v7x.
    x2 = jax.random.normal(k2, (20, 4, 16, 16), dtype=jnp.float32)
    y2 = jax.block_until_ready(flatten_layer(x2, materialize=True))
    assert y2.shape == (20, 1024)
    assert bool(jnp.array_equal(y2, jnp.reshape(x2, (20, -1)))), "mismatch (ragged batch)"

    # bf16: dtype-aware sublane pack (16 rows) and a 2-block batch grid.
    x3 = jax.random.normal(k3, (48, 3, 16, 16), dtype=jnp.bfloat16)
    y3 = jax.block_until_ready(flatten_layer(x3, materialize=True))
    assert y3.shape == (48, 768)
    assert bool(jnp.array_equal(y3, jnp.reshape(x3, (48, -1)))), "mismatch (bf16)"

    # Feature size that is not a multiple of 128 (feat=900): lane tile rounds
    # up to 1024 and the ragged lane block is handled by padding, not by a
    # giant full-dim tile.
    x4 = jax.random.normal(k4, (6, 3, 10, 30), dtype=jnp.float32)
    y4 = jax.block_until_ready(flatten_layer(x4, materialize=True))
    assert y4.shape == (6, 900)
    assert bool(jnp.array_equal(y4, jnp.reshape(x4, (6, -1)))), "mismatch (ragged feat)"

    print("KERNEL_OK")
</pallas_src>

<mosaic_0001>
module attributes {stable_mosaic.version = 11 : i64} {
  func.func @_copy_kernel(%arg0: i32, %arg1: i32, %arg2: memref<2x1024xf32, #tpu.memory_space<vmem>>, %arg3: memref<2x1024xf32, #tpu.memory_space<vmem>>) attributes {dimension_semantics = [#tpu.dimension_semantics<parallel>, #tpu.dimension_semantics<parallel>], iteration_bounds = array<i64: 1, 1>, scalar_prefetch = 0 : i64, scratch_operands = 0 : i64, tpu.core_type = #tpu.core_type<tc>, window_params = [{transform_indices = @transform_0, window_bounds = array<i64: 2, 1024>}, {transform_indices = @transform_1, window_bounds = array<i64: 2, 1024>}]} {
    %c0 = arith.constant 0 : index
    %c0_0 = arith.constant 0 : index
    %0 = vector.load %arg2[%c0, %c0_0] : memref<2x1024xf32, #tpu.memory_space<vmem>>, vector<2x1024xf32>
    %c0_1 = arith.constant 0 : index
    %c0_2 = arith.constant 0 : index
    %1 = vector.load %arg3[%c0_1, %c0_2] : memref<2x1024xf32, #tpu.memory_space<vmem>>, vector<2x1024xf32>
    tpu.vector_store %arg3[%c0_1, %c0_2], %0 {strides = array<i32>} : memref<2x1024xf32, #tpu.memory_space<vmem>>, vector<2x1024xf32>,
    return
  }
  func.func @transform_0(%arg0: i32, %arg1: i32) -> (i32, i32) {
    %c0_i32 = arith.constant 0 : i32
    return %arg0, %arg1 : i32, i32
  }
  func.func @transform_1(%arg0: i32, %arg1: i32) -> (i32, i32) {
    %c0_i32 = arith.constant 0 : i32
    return %arg0, %arg1 : i32, i32
  }
}

</mosaic_0001>

<bundles_post_ra>
// kernel: tpu_custom_call.1
= control target key start
LH: loop header
LB: loop body
LE: loop exit
PB: predicated region body
PF: predicated region fallthrough
CT: control target
= control target key end

     0   :  { %6 = vsyncpa [#allocation3], 0  ;;  %s116_s0 = inlined_call_operand.hbm [shape: f32[2,1024], index: 0, kind: input, shape index: {}]   ;;  %s117_s1 = inlined_call_operand.hbm [shape: f32[2,1024], index: 1, kind: output, shape index: {}]  }
   0x1   :  { %7 = vsyncpa [#allocation4], 0  ;;  %s13_s8 = sshll.u32 %s116_s0, 4  ;;  %s98_s9 = smov [#allocation2]   ;;  %s14_s8 = int_to_ptr.hbm [resolvable:$true] %s13_s8 }
   0x2   :  { %s15_s10 = sshll.u32 %s98_s9, 4  ;;  %s16_s10 = int_to_ptr.vmem [resolvable:$true] %s15_s10 }
   0x3   :  { %18 = dma.hbm_to_vmem [thread:$0]  %s14_s8, 256, %s16_s10, [#allocation3]  }
   0x4   :  { %94 = dma.done.wait [#allocation3], 256  }
   0x5   :  { %95 = vsyncadd [#allocation3], 4294967040  ;;  %s99_s11 = smov [#allocation5]   ;;  %s34_s15 = sshll.u32 %s117_s1, 4  ;;  %v23_v0 = vld [vmem:[#allocation2] sm:$0xff]  ;;  %v24_v1 = vld [vmem:[#allocation2 + $0x8] sm:$0xff]  ;;  %s35_s15 = int_to_ptr.hbm [resolvable:$true] %s34_s15 }
   0x6   :  { %s32_s12 = sshll.u32 %s99_s11, 4  ;;  %25 = vst [vmem:[#allocation5] sm:$0xff] %v23_v0  ;;  %s33_s12 = int_to_ptr.vmem [resolvable:$true] %s32_s12 }
   0x7   :  { %26 = vst [vmem:[#allocation5 + $0x8] sm:$0xff] %v24_v1 }
   0x8   :  { %37 = dma.vmem_to_hbm [thread:$0]  %s33_s12, 256, %s35_s15, [#allocation4]  }
   0x9   :  { %96 = dma.done.wait [#allocation4], 256  }
   0xa   :  { %97 = vsyncadd [#allocation4], 4294967040 }
   0xb   :  { %42 = vsyncpa [#allocation3], 1 }
   0xc   :  { %43 = vsyncpa [#allocation4], 1 }

</bundles_post_ra>
